<compile_context>
chip_gen: v6e
topology: v6e:2x2x1
jax: 0.10.0
libtpu: 0.0.40
codegen_flags: <defaults>
</compile_context>

<pallas_src>
import jax
import jax.numpy as jnp
from jax.experimental import pallas as pl
from jax.experimental.pallas import tpu as pltpu

VMEM = pltpu.MemorySpace.VMEM


def _vspec():
    return pl.BlockSpec(memory_space=VMEM)


# ------------------------------ fused kernel --------------------------------

def gat_forward_kernel(x_ref, a_ref, sel_ref,
                       w1r_ref, w1n_ref, b1_ref,
                       wg_ref, asrc_ref, adst_ref, bg_ref,
                       w2r_ref, w2n_ref, b2_ref,
                       o_ref):
    f32 = jnp.float32
    bf16 = jnp.bfloat16

    # ---- StandardScaler().fit_transform(x): per-feature (x - mean) / std ----
    x = x_ref[...]                                            # (N, Fin) f32
    mean = jnp.mean(x, axis=0, keepdims=True)
    var = jnp.mean((x - mean) ** 2, axis=0, keepdims=True)
    inv_scale = jnp.where(var > 0, jax.lax.rsqrt(var), 1.0)   # scale=1 if std==0
    xs = (x - mean) * inv_scale

    a = a_ref[...]                                            # (N, N) f32
    xs_b = xs.astype(bf16)
    a_b = a.astype(bf16)

    # ---- conv1 = GraphConv: X @ W_root + (A @ X) @ W_rel + b, then ReLU ----
    ax = jnp.dot(a_b, xs_b, preferred_element_type=f32)       # neighbor sum
    x1 = (jnp.dot(xs_b, w1r_ref[...].astype(bf16), preferred_element_type=f32)
          + jnp.dot(ax.astype(bf16), w1n_ref[...].astype(bf16),
                    preferred_element_type=f32)
          + b1_ref[...])
    x1 = jnp.maximum(x1, 0.0)                                 # (N, H)

    # ---- gat1 = GATConv(heads=2, concat=True), then ReLU ----
    h = jnp.dot(xs_b, wg_ref[...], preferred_element_type=f32)  # (N, heads*H)
    n = a.shape[0]
    heads, hdim = asrc_ref.shape
    row = jax.lax.broadcasted_iota(jnp.int32, (n, n), 0)
    col = jax.lax.broadcasted_iota(jnp.int32, (n, n), 1)
    edge = jnp.logical_or(a > 0, row == col)                  # A + self loops
    neg = f32(-1e30)

    head_outs = []
    for hh in range(heads):                                   # static tiny loop
        h_h = h[:, hh * hdim:(hh + 1) * hdim]                 # (N, H)
        a_src = jnp.sum(h_h * asrc_ref[hh:hh + 1, :], axis=-1,
                        keepdims=True)                        # (N, 1) source coeff
        a_dst = jnp.sum(h_h * adst_ref[hh:hh + 1, :], axis=-1,
                        keepdims=True)                        # (N, 1) target coeff
        # logits[i, j] = LeakyReLU(dst_i + src_j, slope 0.2); softmax over j.
        z = a_dst + jnp.transpose(a_src)                      # (N, N)
        z = jnp.where(z >= 0, z, 0.2 * z)
        z = jnp.where(edge, z, neg)
        zmax = jnp.max(z, axis=-1, keepdims=True)
        e = jnp.where(edge, jnp.exp(z - zmax), 0.0)
        denom = jnp.sum(e, axis=-1, keepdims=True)            # >= exp(0) via self loop
        att = e * pl.reciprocal(denom, approx=True)
        head_outs.append(jnp.dot(att.astype(bf16), h_h.astype(bf16),
                                 preferred_element_type=f32))
    x_gat = jnp.concatenate(head_outs, axis=1) + bg_ref[...]  # (N, heads*H)
    x_gat = jnp.maximum(x_gat, 0.0)

    # ---- concat + conv2 = GraphConv (no activation) ----
    x2 = jnp.concatenate([x1, x_gat], axis=1)                 # (N, 3H)
    x2_b = x2.astype(bf16)
    ax2 = jnp.dot(a_b, x2_b, preferred_element_type=f32)
    x3 = (jnp.dot(x2_b, w2r_ref[...].astype(bf16), preferred_element_type=f32)
          + jnp.dot(ax2.astype(bf16), w2n_ref[...].astype(bf16),
                    preferred_element_type=f32)
          + b2_ref[...])                                      # (N, out)

    # ---- global_mean_pool over each graph ----
    sel = sel_ref[...]                                        # (B, N) one-hot(graph)
    counts = jnp.sum(sel, axis=1, keepdims=True)              # (B, 1)
    gm = jnp.dot(sel.astype(bf16), x3.astype(bf16), preferred_element_type=f32)
    gm = gm * pl.reciprocal(counts, approx=True)

    # TODO(synk): F.dropout(p=0.5) is identity in eval; training-mode dropout
    # would use pltpu.prng_seed / pltpu.stateful_bernoulli.
    o_ref[...] = gm


# ------------------------------ wrapper --------------------------------------

def gat_forward(params, x_raw, A, bonehot):
    B = bonehot.shape[0]
    out_feats = params["w2_root"].shape[1]
    return pl.pallas_call(
        gat_forward_kernel,
        out_shape=jax.ShapeDtypeStruct((B, out_feats), jnp.float32),
        in_specs=[_vspec()] * 13,
        out_specs=_vspec(),
        compiler_params=pltpu.CompilerParams(
            vmem_limit_bytes=64 * 1024 * 1024),   # safe on v5e/v6e/v7x
    )(x_raw, A, bonehot,
      params["w1_root"], params["w1_rel"], params["b1"],
      params["wg"], params["att_src"], params["att_dst"], params["bg"],
      params["w2_root"], params["w2_rel"], params["b2"])


# --------------------------- deterministic params ----------------------------

def glorot_uniform(key, shape):
    fan_in, fan_out = shape[0], shape[-1]
    limit = jnp.sqrt(6.0 / (fan_in + fan_out))
    return jax.random.uniform(key, shape, jnp.float32, -limit, limit)


def init_params(key, in_feats, hidden, out_feats, heads=2):
    ks = jax.random.split(key, 7)
    return dict(
        # conv1: GraphConv(in_feats, hidden)
        w1_root=glorot_uniform(ks[0], (in_feats, hidden)),
        w1_rel=glorot_uniform(ks[1], (in_feats, hidden)),
        b1=jnp.zeros((1, hidden), jnp.float32),
        # gat1: GATConv(in_feats, hidden, heads=2, concat=True)
        wg=glorot_uniform(ks[2], (in_feats, heads * hidden)),
        att_src=glorot_uniform(ks[3], (heads, hidden)),
        att_dst=glorot_uniform(ks[4], (heads, hidden)),
        bg=jnp.zeros((1, heads * hidden), jnp.float32),
        # conv2: GraphConv(3*hidden, out_feats)
        w2_root=glorot_uniform(ks[5], (3 * hidden, out_feats)),
        w2_rel=glorot_uniform(ks[6], (3 * hidden, out_feats)),
        b2=jnp.zeros((1, out_feats), jnp.float32),
    )
    # NOTE: self.lin in the reference module is unused in forward().


if __name__ == "__main__":
    in_feats, hidden_feats, out_feats = 16, 32, 8
    n_per_graph, num_graphs = 16, 2
    N = n_per_graph * num_graphs

    key = jax.random.PRNGKey(0)
    kx, ka, kp = jax.random.split(key, 3)

    x_raw = jax.random.normal(kx, (N, in_feats), jnp.float32)

    batch = jnp.repeat(jnp.arange(num_graphs), n_per_graph)
    bonehot = (batch[None, :] ==
               jnp.arange(num_graphs)[:, None]).astype(jnp.float32)   # (B, N)

    same_graph = (batch[:, None] == batch[None, :]).astype(jnp.float32)
    rand = jax.random.uniform(ka, (N, N))
    upper = jnp.triu((rand < 0.35).astype(jnp.float32), k=1)
    A = jnp.maximum(upper, upper.T) * same_graph   # symmetric, no self loops

    params = init_params(kp, in_feats, hidden_feats, out_feats, heads=2)

    fwd = jax.jit(gat_forward)
    out = fwd(params, x_raw, A, bonehot)
    jax.block_until_ready(out)
    assert out.shape == (num_graphs, out_feats)
    assert bool(jnp.all(jnp.isfinite(out)))
    print("KERNEL_OK")
</pallas_src>

<mosaic_0001>
module attributes {stable_mosaic.version = 11 : i64} {
  func.func @gat_forward_kernel(%arg0: memref<32x16xf32, #tpu.memory_space<vmem>>, %arg1: memref<32x32xf32, #tpu.memory_space<vmem>>, %arg2: memref<2x32xf32, #tpu.memory_space<vmem>>, %arg3: memref<16x32xf32, #tpu.memory_space<vmem>>, %arg4: memref<16x32xf32, #tpu.memory_space<vmem>>, %arg5: memref<1x32xf32, #tpu.memory_space<vmem>>, %arg6: memref<16x64xf32, #tpu.memory_space<vmem>>, %arg7: memref<2x32xf32, #tpu.memory_space<vmem>>, %arg8: memref<2x32xf32, #tpu.memory_space<vmem>>, %arg9: memref<1x64xf32, #tpu.memory_space<vmem>>, %arg10: memref<96x8xf32, #tpu.memory_space<vmem>>, %arg11: memref<96x8xf32, #tpu.memory_space<vmem>>, %arg12: memref<1x8xf32, #tpu.memory_space<vmem>>, %arg13: memref<2x8xf32, #tpu.memory_space<vmem>>) attributes {dimension_semantics = [], scalar_prefetch = 0 : i64, scratch_operands = 0 : i64, tpu.core_type = #tpu.core_type<tc>} {
    %c0 = arith.constant 0 : index
    %c0_0 = arith.constant 0 : index
    %0 = vector.load %arg0[%c0, %c0_0] : memref<32x16xf32, #tpu.memory_space<vmem>>, vector<32x16xf32>
    %cst = arith.constant dense<0.000000e+00> : vector<16xf32>
    %1 = vector.multi_reduction <add>, %0, %cst [0] : vector<32x16xf32> to vector<16xf32>
    %2 = vector.shape_cast %1 : vector<16xf32> to vector<1x16xf32>
    %cst_1 = arith.constant 3.200000e+01 : f32
    %3 = vector.broadcast %cst_1 : f32 to vector<1x16xf32>
    %4 = arith.divf %2, %3 : vector<1x16xf32>
    %5 = vector.broadcast %4 : vector<1x16xf32> to vector<32x16xf32>
    %6 = arith.subf %0, %5 : vector<32x16xf32>
    %7 = arith.mulf %6, %6 : vector<32x16xf32>
    %cst_2 = arith.constant dense<0.000000e+00> : vector<16xf32>
    %8 = vector.multi_reduction <add>, %7, %cst_2 [0] : vector<32x16xf32> to vector<16xf32>
    %9 = vector.shape_cast %8 : vector<16xf32> to vector<1x16xf32>
    %cst_3 = arith.constant 3.200000e+01 : f32
    %10 = vector.broadcast %cst_3 : f32 to vector<1x16xf32>
    %11 = arith.divf %9, %10 : vector<1x16xf32>
    %cst_4 = arith.constant 0.000000e+00 : f32
    %12 = vector.broadcast %cst_4 : f32 to vector<1x16xf32>
    %13 = arith.cmpf ogt, %11, %12 : vector<1x16xf32>
    %14 = math.rsqrt %11 : vector<1x16xf32>
    %cst_5 = arith.constant 1.000000e+00 : f32
    %15 = vector.broadcast %cst_5 : f32 to vector<1x16xf32>
    %16 = arith.select %13, %14, %15 : vector<1x16xi1>, vector<1x16xf32>
    %17 = vector.broadcast %4 : vector<1x16xf32> to vector<32x16xf32>
    %18 = arith.subf %0, %17 : vector<32x16xf32>
    %19 = vector.broadcast %16 : vector<1x16xf32> to vector<32x16xf32>
    %20 = arith.mulf %18, %19 : vector<32x16xf32>
    %c0_6 = arith.constant 0 : index
    %c0_7 = arith.constant 0 : index
    %21 = vector.load %arg1[%c0_6, %c0_7] : memref<32x32xf32, #tpu.memory_space<vmem>>, vector<32x32xf32>
    %22 = arith.truncf %20 : vector<32x16xf32> to vector<32x16xbf16>
    %23 = arith.truncf %21 : vector<32x32xf32> to vector<32x32xbf16>
    %cst_8 = arith.constant dense<0.000000e+00> : vector<32x16xf32>
    %24 = tpu.matmul %23, %22, %cst_8 {dimension_numbers = #tpu.dot_dimension_numbers<[1], [0], [0], [1], [0, 0, 1, 1], [], []>} : vector<32x32xbf16>, vector<32x16xbf16>, vector<32x16xf32> -> vector<32x16xf32>
    %c0_9 = arith.constant 0 : index
    %c0_10 = arith.constant 0 : index
    %25 = vector.load %arg3[%c0_9, %c0_10] : memref<16x32xf32, #tpu.memory_space<vmem>>, vector<16x32xf32>
    %26 = arith.truncf %25 : vector<16x32xf32> to vector<16x32xbf16>
    %cst_11 = arith.constant dense<0.000000e+00> : vector<32x32xf32>
    %27 = tpu.matmul %22, %26, %cst_11 {dimension_numbers = #tpu.dot_dimension_numbers<[1], [0], [0], [1], [0, 0, 1, 1], [], []>} : vector<32x16xbf16>, vector<16x32xbf16>, vector<32x32xf32> -> vector<32x32xf32>
    %28 = arith.truncf %24 : vector<32x16xf32> to vector<32x16xbf16>
    %c0_12 = arith.constant 0 : index
    %c0_13 = arith.constant 0 : index
    %29 = vector.load %arg4[%c0_12, %c0_13] : memref<16x32xf32, #tpu.memory_space<vmem>>, vector<16x32xf32>
    %30 = arith.truncf %29 : vector<16x32xf32> to vector<16x32xbf16>
    %cst_14 = arith.constant dense<0.000000e+00> : vector<32x32xf32>
    %31 = tpu.matmul %28, %30, %cst_14 {dimension_numbers = #tpu.dot_dimension_numbers<[1], [0], [0], [1], [0, 0, 1, 1], [], []>} : vector<32x16xbf16>, vector<16x32xbf16>, vector<32x32xf32> -> vector<32x32xf32>
    %32 = arith.addf %27, %31 : vector<32x32xf32>
    %c0_15 = arith.constant 0 : index
    %c0_16 = arith.constant 0 : index
    %33 = vector.load %arg5[%c0_15, %c0_16] : memref<1x32xf32, #tpu.memory_space<vmem>>, vector<1x32xf32>
    %34 = vector.broadcast %33 : vector<1x32xf32> to vector<32x32xf32>
    %35 = arith.addf %32, %34 : vector<32x32xf32>
    %cst_17 = arith.constant 0.000000e+00 : f32
    %36 = vector.broadcast %cst_17 : f32 to vector<32x32xf32>
    %37 = arith.maximumf %35, %36 : vector<32x32xf32>
    %c0_18 = arith.constant 0 : index
    %c0_19 = arith.constant 0 : index
    %38 = vector.load %arg6[%c0_18, %c0_19] : memref<16x64xf32, #tpu.memory_space<vmem>>, vector<16x64xf32>
    %cst_20 = arith.constant dense<0.000000e+00> : vector<32x64xf32>
    %39 = tpu.matmul %22, %38, %cst_20 {dimension_numbers = #tpu.dot_dimension_numbers<[1], [0], [0], [1], [0, 0, 1, 1], [], []>} : vector<32x16xbf16>, vector<16x64xf32>, vector<32x64xf32> -> vector<32x64xf32>
    %40 = tpu.iota {dimensions = array<i32: 0>} : vector<32x32xi32>
    %41 = tpu.iota {dimensions = array<i32: 1>} : vector<32x32xi32>
    %cst_21 = arith.constant 0.000000e+00 : f32
    %42 = vector.broadcast %cst_21 : f32 to vector<32x32xf32>
    %43 = arith.cmpf ogt, %21, %42 : vector<32x32xf32>
    %44 = arith.cmpi eq, %40, %41 : vector<32x32xi32>
    %45 = arith.ori %43, %44 : vector<32x32xi1>
    %46 = vector.extract_strided_slice %39 {offsets = [0, 0], sizes = [32, 32], strides = [1, 1]} : vector<32x64xf32> to vector<32x32xf32>
    %c0_22 = arith.constant 0 : index
    %c0_23 = arith.constant 0 : index
    %47 = vector.load %arg7[%c0_22, %c0_23] : memref<2x32xf32, #tpu.memory_space<vmem>>, vector<1x32xf32>
    %48 = vector.broadcast %47 : vector<1x32xf32> to vector<32x32xf32>
    %49 = arith.mulf %46, %48 : vector<32x32xf32>
    %cst_24 = arith.constant dense<0.000000e+00> : vector<32xf32>
    %50 = vector.multi_reduction <add>, %49, %cst_24 [1] : vector<32x32xf32> to vector<32xf32>
    %51 = vector.shape_cast %50 : vector<32xf32> to vector<32x1xf32>
    %c0_25 = arith.constant 0 : index
    %c0_26 = arith.constant 0 : index
    %52 = vector.load %arg8[%c0_25, %c0_26] : memref<2x32xf32, #tpu.memory_space<vmem>>, vector<1x32xf32>
    %53 = vector.broadcast %52 : vector<1x32xf32> to vector<32x32xf32>
    %54 = arith.mulf %46, %53 : vector<32x32xf32>
    %cst_27 = arith.constant dense<0.000000e+00> : vector<32xf32>
    %55 = vector.multi_reduction <add>, %54, %cst_27 [1] : vector<32x32xf32> to vector<32xf32>
    %56 = vector.shape_cast %55 : vector<32xf32> to vector<32x1xf32>
    %57 = tpu.transpose %51, [1, 0] : vector<32x1xf32> -> vector<1x32xf32>
    %58 = vector.broadcast %56 : vector<32x1xf32> to vector<32x32xf32>
    %59 = vector.broadcast %57 : vector<1x32xf32> to vector<32x32xf32>
    %60 = arith.addf %58, %59 : vector<32x32xf32>
    %cst_28 = arith.constant 0.000000e+00 : f32
    %61 = vector.broadcast %cst_28 : f32 to vector<32x32xf32>
    %62 = arith.cmpf oge, %60, %61 : vector<32x32xf32>
    %cst_29 = arith.constant 2.000000e-01 : f32
    %63 = vector.broadcast %cst_29 : f32 to vector<32x32xf32>
    %64 = arith.mulf %63, %60 : vector<32x32xf32>
    %65 = arith.select %62, %60, %64 : vector<32x32xi1>, vector<32x32xf32>
    %cst_30 = arith.constant -1.000000e+30 : f32
    %66 = vector.broadcast %cst_30 : f32 to vector<32x32xf32>
    %67 = arith.select %45, %65, %66 : vector<32x32xi1>, vector<32x32xf32>
    %cst_31 = arith.constant dense<0xFF800000> : vector<32xf32>
    %68 = vector.multi_reduction <maximumf>, %67, %cst_31 [1] : vector<32x32xf32> to vector<32xf32>
    %69 = vector.shape_cast %68 : vector<32xf32> to vector<32x1xf32>
    %70 = vector.broadcast %69 : vector<32x1xf32> to vector<32x32xf32>
    %71 = arith.subf %67, %70 : vector<32x32xf32>
    %72 = math.exp %71 : vector<32x32xf32>
    %cst_32 = arith.constant 0.000000e+00 : f32
    %73 = vector.broadcast %cst_32 : f32 to vector<32x32xf32>
    %74 = arith.select %45, %72, %73 : vector<32x32xi1>, vector<32x32xf32>
    %cst_33 = arith.constant dense<0.000000e+00> : vector<32xf32>
    %75 = vector.multi_reduction <add>, %74, %cst_33 [1] : vector<32x32xf32> to vector<32xf32>
    %76 = vector.shape_cast %75 : vector<32xf32> to vector<32x1xf32>
    %77 = tpu.reciprocal %76 {approx = true} : vector<32x1xf32> -> vector<32x1xf32>
    %78 = vector.broadcast %77 : vector<32x1xf32> to vector<32x32xf32>
    %79 = arith.mulf %74, %78 : vector<32x32xf32>
    %80 = arith.truncf %79 : vector<32x32xf32> to vector<32x32xbf16>
    %81 = arith.truncf %46 : vector<32x32xf32> to vector<32x32xbf16>
    %cst_34 = arith.constant dense<0.000000e+00> : vector<32x32xf32>
    %82 = tpu.matmul %80, %81, %cst_34 {dimension_numbers = #tpu.dot_dimension_numbers<[1], [0], [0], [1], [0, 0, 1, 1], [], []>} : vector<32x32xbf16>, vector<32x32xbf16>, vector<32x32xf32> -> vector<32x32xf32>
    %83 = vector.extract_strided_slice %39 {offsets = [0, 32], sizes = [32, 32], strides = [1, 1]} : vector<32x64xf32> to vector<32x32xf32>
    %c1 = arith.constant 1 : index
    %c0_35 = arith.constant 0 : index
    %84 = vector.load %arg7[%c1, %c0_35] : memref<2x32xf32, #tpu.memory_space<vmem>>, vector<1x32xf32>
    %85 = vector.broadcast %84 : vector<1x32xf32> to vector<32x32xf32>
    %86 = arith.mulf %83, %85 : vector<32x32xf32>
    %cst_36 = arith.constant dense<0.000000e+00> : vector<32xf32>
    %87 = vector.multi_reduction <add>, %86, %cst_36 [1] : vector<32x32xf32> to vector<32xf32>
    %88 = vector.shape_cast %87 : vector<32xf32> to vector<32x1xf32>
    %c1_37 = arith.constant 1 : index
    %c0_38 = arith.constant 0 : index
    %89 = vector.load %arg8[%c1_37, %c0_38] : memref<2x32xf32, #tpu.memory_space<vmem>>, vector<1x32xf32>
    %90 = vector.broadcast %89 : vector<1x32xf32> to vector<32x32xf32>
    %91 = arith.mulf %83, %90 : vector<32x32xf32>
    %cst_39 = arith.constant dense<0.000000e+00> : vector<32xf32>
    %92 = vector.multi_reduction <add>, %91, %cst_39 [1] : vector<32x32xf32> to vector<32xf32>
    %93 = vector.shape_cast %92 : vector<32xf32> to vector<32x1xf32>
    %94 = tpu.transpose %88, [1, 0] : vector<32x1xf32> -> vector<1x32xf32>
    %95 = vector.broadcast %93 : vector<32x1xf32> to vector<32x32xf32>
    %96 = vector.broadcast %94 : vector<1x32xf32> to vector<32x32xf32>
    %97 = arith.addf %95, %96 : vector<32x32xf32>
    %cst_40 = arith.constant 0.000000e+00 : f32
    %98 = vector.broadcast %cst_40 : f32 to vector<32x32xf32>
    %99 = arith.cmpf oge, %97, %98 : vector<32x32xf32>
    %cst_41 = arith.constant 2.000000e-01 : f32
    %100 = vector.broadcast %cst_41 : f32 to vector<32x32xf32>
    %101 = arith.mulf %100, %97 : vector<32x32xf32>
    %102 = arith.select %99, %97, %101 : vector<32x32xi1>, vector<32x32xf32>
    %cst_42 = arith.constant -1.000000e+30 : f32
    %103 = vector.broadcast %cst_42 : f32 to vector<32x32xf32>
    %104 = arith.select %45, %102, %103 : vector<32x32xi1>, vector<32x32xf32>
    %cst_43 = arith.constant dense<0xFF800000> : vector<32xf32>
    %105 = vector.multi_reduction <maximumf>, %104, %cst_43 [1] : vector<32x32xf32> to vector<32xf32>
    %106 = vector.shape_cast %105 : vector<32xf32> to vector<32x1xf32>
    %107 = vector.broadcast %106 : vector<32x1xf32> to vector<32x32xf32>
    %108 = arith.subf %104, %107 : vector<32x32xf32>
    %109 = math.exp %108 : vector<32x32xf32>
    %cst_44 = arith.constant 0.000000e+00 : f32
    %110 = vector.broadcast %cst_44 : f32 to vector<32x32xf32>
    %111 = arith.select %45, %109, %110 : vector<32x32xi1>, vector<32x32xf32>
    %cst_45 = arith.constant dense<0.000000e+00> : vector<32xf32>
    %112 = vector.multi_reduction <add>, %111, %cst_45 [1] : vector<32x32xf32> to vector<32xf32>
    %113 = vector.shape_cast %112 : vector<32xf32> to vector<32x1xf32>
    %114 = tpu.reciprocal %113 {approx = true} : vector<32x1xf32> -> vector<32x1xf32>
    %115 = vector.broadcast %114 : vector<32x1xf32> to vector<32x32xf32>
    %116 = arith.mulf %111, %115 : vector<32x32xf32>
    %117 = arith.truncf %116 : vector<32x32xf32> to vector<32x32xbf16>
    %118 = arith.truncf %83 : vector<32x32xf32> to vector<32x32xbf16>
    %cst_46 = arith.constant dense<0.000000e+00> : vector<32x32xf32>
    %119 = tpu.matmul %117, %118, %cst_46 {dimension_numbers = #tpu.dot_dimension_numbers<[1], [0], [0], [1], [0, 0, 1, 1], [], []>} : vector<32x32xbf16>, vector<32x32xbf16>, vector<32x32xf32> -> vector<32x32xf32>
    %120 = tpu.concatenate %82, %119 in 1 : vector<32x32xf32>, vector<32x32xf32> -> vector<32x64xf32>
    %c0_47 = arith.constant 0 : index
    %c0_48 = arith.constant 0 : index
    %121 = vector.load %arg9[%c0_47, %c0_48] : memref<1x64xf32, #tpu.memory_space<vmem>>, vector<1x64xf32>
    %122 = vector.broadcast %121 : vector<1x64xf32> to vector<32x64xf32>
    %123 = arith.addf %120, %122 : vector<32x64xf32>
    %cst_49 = arith.constant 0.000000e+00 : f32
    %124 = vector.broadcast %cst_49 : f32 to vector<32x64xf32>
    %125 = arith.maximumf %123, %124 : vector<32x64xf32>
    %126 = tpu.concatenate %37, %125 in 1 : vector<32x32xf32>, vector<32x64xf32> -> vector<32x96xf32>
    %127 = arith.truncf %126 : vector<32x96xf32> to vector<32x96xbf16>
    %cst_50 = arith.constant dense<0.000000e+00> : vector<32x96xf32>
    %128 = tpu.matmul %23, %127, %cst_50 {dimension_numbers = #tpu.dot_dimension_numbers<[1], [0], [0], [1], [0, 0, 1, 1], [], []>} : vector<32x32xbf16>, vector<32x96xbf16>, vector<32x96xf32> -> vector<32x96xf32>
    %c0_51 = arith.constant 0 : index
    %c0_52 = arith.constant 0 : index
    %129 = vector.load %arg10[%c0_51, %c0_52] : memref<96x8xf32, #tpu.memory_space<vmem>>, vector<96x8xf32>
    %130 = arith.truncf %129 : vector<96x8xf32> to vector<96x8xbf16>
    %cst_53 = arith.constant dense<0.000000e+00> : vector<32x8xf32>
    %131 = tpu.matmul %127, %130, %cst_53 {dimension_numbers = #tpu.dot_dimension_numbers<[1], [0], [0], [1], [0, 0, 1, 1], [], []>} : vector<32x96xbf16>, vector<96x8xbf16>, vector<32x8xf32> -> vector<32x8xf32>
    %132 = arith.truncf %128 : vector<32x96xf32> to vector<32x96xbf16>
    %c0_54 = arith.constant 0 : index
    %c0_55 = arith.constant 0 : index
    %133 = vector.load %arg11[%c0_54, %c0_55] : memref<96x8xf32, #tpu.memory_space<vmem>>, vector<96x8xf32>
    %134 = arith.truncf %133 : vector<96x8xf32> to vector<96x8xbf16>
    %cst_56 = arith.constant dense<0.000000e+00> : vector<32x8xf32>
    %135 = tpu.matmul %132, %134, %cst_56 {dimension_numbers = #tpu.dot_dimension_numbers<[1], [0], [0], [1], [0, 0, 1, 1], [], []>} : vector<32x96xbf16>, vector<96x8xbf16>, vector<32x8xf32> -> vector<32x8xf32>
    %136 = arith.addf %131, %135 : vector<32x8xf32>
    %c0_57 = arith.constant 0 : index
    %c0_58 = arith.constant 0 : index
    %137 = vector.load %arg12[%c0_57, %c0_58] : memref<1x8xf32, #tpu.memory_space<vmem>>, vector<1x8xf32>
    %138 = vector.broadcast %137 : vector<1x8xf32> to vector<32x8xf32>
    %139 = arith.addf %136, %138 : vector<32x8xf32>
    %c0_59 = arith.constant 0 : index
    %c0_60 = arith.constant 0 : index
    %140 = vector.load %arg2[%c0_59, %c0_60] : memref<2x32xf32, #tpu.memory_space<vmem>>, vector<2x32xf32>
    %cst_61 = arith.constant dense<0.000000e+00> : vector<2xf32>
    %141 = vector.multi_reduction <add>, %140, %cst_61 [1] : vector<2x32xf32> to vector<2xf32>
    %142 = vector.shape_cast %141 : vector<2xf32> to vector<2x1xf32>
    %143 = arith.truncf %140 : vector<2x32xf32> to vector<2x32xbf16>
    %144 = arith.truncf %139 : vector<32x8xf32> to vector<32x8xbf16>
    %cst_62 = arith.constant dense<0.000000e+00> : vector<2x8xf32>
    %145 = tpu.matmul %143, %144, %cst_62 {dimension_numbers = #tpu.dot_dimension_numbers<[1], [0], [0], [1], [0, 0, 1, 1], [], []>} : vector<2x32xbf16>, vector<32x8xbf16>, vector<2x8xf32> -> vector<2x8xf32>
    %146 = tpu.reciprocal %142 {approx = true} : vector<2x1xf32> -> vector<2x1xf32>
    %147 = vector.broadcast %146 : vector<2x1xf32> to vector<2x8xf32>
    %148 = arith.mulf %145, %147 : vector<2x8xf32>
    %c0_63 = arith.constant 0 : index
    %c0_64 = arith.constant 0 : index
    %149 = vector.load %arg13[%c0_63, %c0_64] : memref<2x8xf32, #tpu.memory_space<vmem>>, vector<2x8xf32>
    tpu.vector_store %arg13[%c0_63, %c0_64], %148 {strides = array<i32>} : memref<2x8xf32, #tpu.memory_space<vmem>>, vector<2x8xf32>,
    return
  }
}

</mosaic_0001>

<bundles_post_ra>
// kernel: gat_forward.1
= control target key start
LH: loop header
LB: loop body
LE: loop exit
PB: predicated region body
PF: predicated region fallthrough
CT: control target
= control target key end

     0   :  { %vm50_vm0 = vcmask 130048   ;;  %vm103_vm1 = vcmask 261120   ;;  %s1421_s21 = smov 32   ;;  %s1856_s0 = inlined_call_operand.vmem [shape: f32[32,16], index: 0, kind: input, shape index: {}]   ;;  %s1857_s1 = inlined_call_operand.vmem [shape: f32[32,32], index: 1, kind: input, shape index: {}]   ;;  %s1858_s2 = inlined_call_operand.vmem [shape: f32[2,32], index: 2, kind: input, shape index: {}]   ;;  %s1859_s3 = inlined_call_operand.vmem [shape: f32[16,32], index: 3, kind: input, shape index: {}]   ;;  %s1860_s4 = inlined_call_operand.vmem [shape: f32[16,32], index: 4, kind: input, shape index: {}]   ;;  %s1861_s5 = inlined_call_operand.vmem [shape: f32[1,32], index: 5, kind: input, shape index: {}]   ;;  %s1862_s6 = inlined_call_operand.vmem [shape: f32[16,64], index: 6, kind: input, shape index: {}]   ;;  %s1863_s7 = inlined_call_operand.vmem [shape: f32[2,32], index: 7, kind: input, shape index: {}]   ;;  %s1864_s8 = inlined_call_operand.vmem [shape: f32[2,32], index: 8, kind: input, shape index: {}]   ;;  %s1865_s9 = inlined_call_operand.vmem [shape: f32[1,64], index: 9, kind: input, shape index: {}]   ;;  %s1866_s10 = inlined_call_operand.vmem [shape: f32[96,8], index: 10, kind: input, shape index: {}]   ;;  %s1867_s11 = inlined_call_operand.vmem [shape: f32[96,8], index: 11, kind: input, shape index: {}]   ;;  %s1868_s12 = inlined_call_operand.vmem [shape: f32[1,8], index: 12, kind: input, shape index: {}]   ;;  %s1869_s13 = inlined_call_operand.hbm [shape: f32[2,8], index: 13, kind: output, shape index: {}]  }
   0x1   :  { %v46_v0 = vld [vmem:[%s1856_s0] sm:$0xff]  ;;  %v47_v1 = vld [vmem:[%s1856_s0 + $0x8] sm:$0xff]  ;;  %v48_v2 = vld [vmem:[%s1856_s0 + $0x10] sm:$0xff] }
   0x2   :  { %v49_v3 = vld [vmem:[%s1856_s0 + $0x18] sm:$0xff]  ;;  %v51_v4 = vsel %vm50_vm0, %v46_v0, 0.0  ;;  %v52_v5 = vsel %vm50_vm0, %v47_v1, 0.0  ;;  %v54_v6 = vsel %vm50_vm0, %v48_v2, 0.0  ;;  %v1514_v7 = vld [vmem:[%s1857_s1] sm:$0xff]  ;;  %v1519_v8 = vld [vmem:[%s1857_s1 + $0x8] sm:$0xff] }
   0x3   :  { %v53_v9 = vadd.f32 %v52_v5, %v51_v4  ;;  %v1523_v10 = vpack.c.bf16 %v1519_v8, %v1514_v7  ;;  %v56_v11 = vsel %vm50_vm0, %v49_v3, 0.0  ;;  %v1198_v12 = vld [vmem:[%s1863_s7 + $0x1] ss:$0 sm:$0xff] }
   0x4   :  { %605 = vrot.lane.b32.xlu0 %v1198_v12, %s1421_s21 }
   0x5   :  { %v55_v13 = vadd.f32 %v54_v6, %v53_v9  ;;  %1260 = vmatprep.mubr.msk.bf16.mxu0 %vm103_vm1, %v1523_v10 }
   0x6   :  { %18 = vsyncpa [#allocation3], 0  ;;  %v1199_v14 = vld [vmem:[%s1864_s8 + $0x1] ss:$0 sm:$0xff]  ;;  %v1543_v53 = vld [vmem:[%s1857_s1 + $0x10] sm:$0xff]  ;;  %vm382_vm3 = vcmp.gt.f32.partialorder %v1514_v7, 0.0 }
   0x7   :  { %v57_v15 = vadd.f32 %v56_v11, %v55_v13  ;;  %v1548_v54 = vld [vmem:[%s1857_s1 + $0x18] sm:$0xff]  ;;  %v293_v55 = vld [vmem:[%s1862_s6 + $0x8] sm:$0xff]  ;;  %v292_v57 = vld [vmem:[%s1862_s6] sm:$0xff]  ;;  %vm383_vm5 = vcmp.gt.f32.partialorder %v1519_v8, 0.0  ;;  %vm384_vm11 = vcmp.gt.f32.partialorder %v1543_v53, 0.0 }
   0x8   :  { %646 = vrot.lane.b32.xlu0 %v1199_v14, %s1421_s21  ;;  %v1555_v56 = vpack.c.bf16 %v1548_v54, %v1543_v53  ;;  %v164_v58 = vld [vmem:[%s1860_s4] sm:$0xff]  ;;  %v165_v59 = vld [vmem:[%s1860_s4 + $0x8] sm:$0xff]  ;;  %vm385_vm15 = vcmp.gt.f32.partialorder %v1548_v54, 0.0 }
   0x9   :  { %v58_v16 = vrot.slane %v57_v15, 4  ;;  %v166_v60 = vpack.c.bf16 %v165_v59, %v164_v58  ;;  %v159_v61 = vld [vmem:[%s1859_s3] sm:$0xff]  ;;  %v160_v62 = vld [vmem:[%s1859_s3 + $0x8] sm:$0xff]  ;;  %s1422_s3 = smov 96  }
   0xa   :  { %v161_v63 = vpack.c.bf16 %v160_v62, %v159_v61 }
   0xb   :  { %v59_v17 = vadd.f32 %v58_v16, %v57_v15  ;;  %1264 = vmatprep.subr.bf16.mxu1 %v166_v60 }
   0xc   :  { %1265 = vmatpush3.bf16.msra.mxu1 %v166_v60 }
   0xd   :  { %v60_v18 = vrot.slane %v59_v17, 2  ;;  %1270 = vmatprep.subr.bf16.mxu1 %v161_v63 }
   0xf   :  { %v61_v19 = vadd.f32 %v60_v18, %v59_v17 }
  0x11   :  { %v62_v20 = vrot.slane %v61_v19, 1 }
  0x13   :  { %v63_v21 = vadd.f32 %v62_v20, %v61_v19 }
  0x15   :  { %v65_v22 = vmul.f32 0.03125, %v63_v21 }
  0x17   :  { %v66_v23 = vsub.f32 %v46_v0, %v65_v22  ;;  %v67_v24 = vsub.f32 %v47_v1, %v65_v22  ;;  %v68_v25 = vsub.f32 %v48_v2, %v65_v22  ;;  %v69_v26 = vsub.f32 %v49_v3, %v65_v22 }
  0x19   :  { %v70_v27 = vmul.f32 %v66_v23, %v66_v23  ;;  %v71_v28 = vmul.f32 %v67_v24, %v67_v24  ;;  %v72_v29 = vmul.f32 %v68_v25, %v68_v25  ;;  %v73_v30 = vmul.f32 %v69_v26, %v69_v26 }
  0x1b   :  { %v74_v31 = vsel %vm50_vm0, %v70_v27, 0.0  ;;  %v75_v32 = vsel %vm50_vm0, %v71_v28, 0.0  ;;  %v77_v33 = vsel %vm50_vm0, %v72_v29, 0.0  ;;  %v79_v35 = vsel %vm50_vm0, %v73_v30, 0.0 }
  0x1c   :  { %v76_v34 = vadd.f32 %v75_v32, %v74_v31 }
  0x1e   :  { %v78_v36 = vadd.f32 %v77_v33, %v76_v34 }
  0x20   :  { %v80_v37 = vadd.f32 %v79_v35, %v78_v36  ;;  %v1194_v36 = vld [vmem:[%s1863_s7] ss:$0 sm:$0xff] }
  0x22   :  { %v81_v38 = vrot.slane %v80_v37, 4 }
  0x24   :  { %v82_v39 = vadd.f32 %v81_v38, %v80_v37 }
  0x26   :  { %v83_v40 = vrot.slane %v82_v39, 2 }
  0x28   :  { %v84_v41 = vadd.f32 %v83_v40, %v82_v39 }
  0x2a   :  { %v85_v42 = vrot.slane %v84_v41, 1 }
  0x2c   :  { %v86_v43 = vadd.f32 %v85_v42, %v84_v41 }
  0x2e   :  { %v87_v44 = vmul.f32 0.03125, %v86_v43 }
  0x30   :  { %1363 = vrsqrt.f32 %v87_v44  ;;  %vm88_vm2 = vcmp.gt.f32.partialorder %v87_v44, 0.0 }
  0x3d   :  { %v1364_v45 = vpop.eup %1363 }
  0x3e   :  { %v90_v46 = vsel %vm88_vm2, %v1364_v45, 1.0 }
  0x3f   :  { %v93_v47 = vmul.f32 %v90_v46, %v68_v25  ;;  %v94_v48 = vmul.f32 %v90_v46, %v69_v26  ;;  %v91_v49 = vmul.f32 %v90_v46, %v66_v23  ;;  %v92_v50 = vmul.f32 %v90_v46, %v67_v24 }
  0x41   :  { %v100_v51 = vpack.c.bf16 %v94_v48, %v93_v47  ;;  %v99_v52 = vpack.c.bf16 %v92_v50, %v91_v49  ;;  %v1195_v49 = vld [vmem:[%s1864_s8] ss:$0 sm:$0xff] }
  0x43   :  { %1256 = vmatprep.subr.bf16.mxu0 %v100_v51 }
  0x44   :  { %1257 = vmatpush3.bf16.msra.mxu0 %v100_v51 }
  0x45   :  { %1258 = vmatprep.subr.bf16.mxu0 %v99_v52 }
  0x48   :  { %1259 = vmatpush3.bf16.msra.mxu0 %v99_v52 }
  0x49   :  { %1276 = vmatprep.subr.mxu0 %v293_v55 }
  0x4b   :  { %1261 = vmatmul.mubr.msk.bf16.vlgmr.msra.gmra.mxu0 %vm103_vm1, %v1555_v56 }
  0x4c   :  { %1277 = vmatpush3.msra.mxu0 %v293_v55  ;;  %1280 = vmatprep.mubr.msk.bf16.mxu0 %vm50_vm0, %v99_v52 }
  0x4d   :  { %1278 = vmatprep.subr.mxu0 %v292_v57 }
  0x4e   :  { %1279 = vmatpush3.msra.mxu0 %v292_v57 }
  0x53   :  { %1281 = vmatmul.mubr.msk.bf16.vlgmr.msra.gmra.mxu0 %vm50_vm0, %v100_v51 }
  0x76   :  { %v606_v3 = vpop.permute.xlu0 %605 }
  0x7a   :  { %v647_v14 = vpop.permute.xlu0 %646 }
 0x10b   :  { %v1262_v0 = vpop.f32.mrf.mxu0 }
 0x10d   :  { %v144_v1 = vpop.f32.mrf.mxu0 }
 0x10f   :  { %v1263_v2 = vpop.f32.mrf.mxu0 }
 0x110   :  { %v163_v6 = vpack.c.bf16 %v1263_v2, %v1262_v0 }
 0x111   :  { %v147_v4 = vpop.f32.mrf.mxu0 }
 0x112   :  { %v162_v5 = vpack.c.bf16 %v147_v4, %v144_v1 }
 0x113   :  { %v1576_v9 = vpop.f32.mrf.mxu0 }
 0x114   :  { %1266 = vmatprep.mubr.msk.bf16.mxu1 %vm50_vm0, %v162_v5  ;;  %v610_v11 = vmul.f32 %v1576_v9, %v606_v3  ;;  %v651_v20 = vmul.f32 %v1576_v9, %v647_v14  ;;  %v401_v43 = vmul.f32 %v1576_v9, %v1194_v36  ;;  %v422_v58 = vmul.f32 %v1576_v9, %v1195_v49 }
 0x115   :  { %1267 = vmatmul.mubr.msk.bf16.vlgmr.msra.gmra.mxu1 %vm50_vm0, %v163_v6  ;;  %v1581_v12 = vpop.f32.mrf.mxu0 }
 0x116   :  { %620 = vrot.lane.b32.xlu0 %v610_v11, %s1422_s3  ;;  %v608_v13 = vmul.f32 %v606_v3, %v1581_v12  ;;  %1271 = vmatpush3.bf16.msra.mxu1 %v161_v63  ;;  %v649_v16 = vmul.f32 %v647_v14, %v1581_v12  ;;  %v399_v38 = vmul.f32 %v1194_v36, %v1581_v12  ;;  %v409_v46 = vsel %vm103_vm1, %v401_v43, 0.0 }
 0x117   :  { %v1585_v15 = vpop.f32.mrf.mxu0  ;;  %1272 = vmatprep.mubr.msk.bf16.mxu1 %vm50_vm0, %v99_v52  ;;  %v430_v59 = vsel %vm103_vm1, %v422_v58, 0.0 }
 0x118   :  { %616 = vrot.lane.b32.xlu1 %v608_v13, %s1422_s3  ;;  %v1592_v17 = vpack.c.bf16 %v1585_v15, %v1576_v9  ;;  %v611_v22 = vmul.f32 %v1585_v15, %v606_v3  ;;  %v652_v23 = vmul.f32 %v1585_v15, %v647_v14  ;;  %v403_v42 = vsel %vm103_vm1, %v399_v38, 0.0 }
 0x119   :  { %v363_v18 = vpop.f32.mrf.mxu0  ;;  %v402_v48 = vmul.f32 %v1585_v15, %v1194_v36  ;;  %v423_v60 = vmul.f32 %v1585_v15, %v1195_v49 }
 0x11a   :  { %657 = vrot.lane.b32.xlu0 %v649_v16, %s1422_s3  ;;  %1284 = vmatprep.subr.bf16.mxu1 %v1592_v17  ;;  %v609_v19 = vmul.f32 %v606_v3, %v363_v18  ;;  %v1600_v21 = vpack.c.bf16 %v363_v18, %v1581_v12  ;;  %v650_v24 = vmul.f32 %v647_v14, %v363_v18 }
 0x11b   :  { %v400_v41 = vmul.f32 %v1194_v36, %v363_v18  ;;  %v412_v50 = vsel %vm103_vm1, %v402_v48, 0.0  ;;  %v421_v55 = vmul.f32 %v1195_v49, %v363_v18  ;;  %v433_v61 = vsel %vm103_vm1, %v423_v60, 0.0 }
 0x11c   :  { %618 = vrot.lane.b32.xlu1 %v609_v19, %s1422_s3  ;;  %v375_v18 = vlaneseq }
 0x11d   :  { %1273 = vmatmul.mubr.msk.bf16.vlgmr.msra.gmra.mxu1 %vm50_vm0, %v100_v51  ;;  %v406_v44 = vsel %vm103_vm1, %v400_v41, 0.0  ;;  %v420_v51 = vmul.f32 %v1195_v49, %v1581_v12  ;;  %v427_v57 = vsel %vm103_vm1, %v421_v55, 0.0 }
 0x11e   :  { %1285 = vmatpush3.bf16.msra.mxu1 %v1592_v17  ;;  %661 = vrot.lane.b32.xlu0 %v651_v20, %s1422_s3 }
 0x11f   :  { %1286 = vmatprep.subr.bf16.mxu1 %v1600_v21  ;;  %v424_v52 = vsel %vm103_vm1, %v420_v51, 0.0 }
 0x120   :  { %622 = vrot.lane.b32.xlu1 %v611_v22, %s1422_s3  ;;  %v1647_v22 = vshrl.u32 %v375_v18, 7 }
 0x122   :  { %1287 = vmatpush3.bf16.msra.mxu1 %v1600_v21  ;;  %v379_v7 = vadd.s32 24, %v1647_v22 }
 0x124   :  { %663 = vrot.lane.b32.xlu1 %v652_v23, %s1422_s3 }
 0x128   :  { %659 = vrot.lane.b32.xlu1 %v650_v24, %s1422_s3 }
 0x188   :  { %v621_v25 = vpop.permute.xlu0 %620 }
 0x189   :  { %v634_v31 = vsel %vm103_vm1, %v621_v25, 0.0  ;;  %v470_v25 = vsub.s32 0, %v1647_v22 }
 0x18a   :  { %v617_v26 = vpop.permute.xlu1 %616 }
 0x18b   :  { %v628_v27 = vsel %vm103_vm1, %v617_v26, 0.0  ;;  %v381_v26 = vand.u32 127, %v375_v18 }
 0x18c   :  { %v658_v28 = vpop.permute.xlu0 %657  ;;  %629 = vadd.xlane.f32.xlu0 %v628_v27  ;;  %v377_v27 = vadd.s32 8, %v1647_v22 }
 0x18d   :  { %v669_v29 = vsel %vm103_vm1, %v658_v28, 0.0  ;;  %vm386_vm4 = vcmp.eq.s32.totalorder %v1647_v22, %v381_v26  ;;  %vm389_vm0 = vcmp.eq.s32.totalorder %v379_v7, %v381_v26 }
 0x18e   :  { %670 = vadd.xlane.f32.xlu1 %v669_v29  ;;  %v619_v30 = vpop.permute.xlu1 %618  ;;  %vm387_vm6 = vcmp.eq.s32.totalorder %v377_v27, %v381_v26  ;;  %vm1657_vm7 = vmor %vm382_vm3, %vm386_vm4 }
 0x18f   :  { %v631_v32 = vsel %vm103_vm1, %v619_v30, 0.0  ;;  %vm1662_vm10 = vmor %vm383_vm5, %vm387_vm6 }
 0x190   :  { %635 = vadd.xlane.f32.xlu0 %v634_v31  ;;  %v662_v33 = vpop.permute.xlu0 %661  ;;  %vm1680_vm3 = vmor %vm385_vm15, %vm389_vm0 }
 0x191   :  { %v675_v37 = vsel %vm103_vm1, %v662_v33, 0.0 }
 0x192   :  { %632 = vadd.xlane.f32.xlu1 %v631_v32  ;;  %v623_v34 = vpop.permute.xlu1 %622 }
 0x193   :  { %v637_v35 = vsel %vm103_vm1, %v623_v34, 0.0  ;;  %v378_v34 = vadd.s32 16, %v1647_v22 }
 0x194   :  { %638 = vadd.xlane.f32.xlu0 %v637_v35 }
 0x195   :  { %vm388_vm12 = vcmp.eq.s32.totalorder %v378_v34, %v381_v26 }
 0x196   :  { %676 = vadd.xlane.f32.xlu1 %v675_v37  ;;  %v664_v39 = vpop.permute.xlu1 %663  ;;  %vm1672_vm14 = vmor %vm384_vm11, %vm388_vm12  ;;  %vm1169_vm11 = vcmask 58368  }
 0x197   :  { %v678_v40 = vsel %vm103_vm1, %v664_v39, 0.0 }
 0x198   :  { %679 = vadd.xlane.f32.xlu0 %v678_v40 }
 0x19a   :  { %404 = vadd.xlane.f32.xlu1 %v403_v42  ;;  %v660_v45 = vpop.permute.xlu1 %659 }
 0x19b   :  { %v672_v47 = vsel %vm103_vm1, %v660_v45, 0.0 }
 0x19c   :  { %407 = vadd.xlane.f32.xlu0 %v406_v44 }
 0x19e   :  { %410 = vadd.xlane.f32.xlu1 %v409_v46 }
 0x1a0   :  { %673 = vadd.xlane.f32.xlu0 %v672_v47 }
 0x1a4   :  { %413 = vadd.xlane.f32.xlu0 %v412_v50 }
 0x1a8   :  { %425 = vadd.xlane.f32.xlu0 %v424_v52 }
 0x1ac   :  { %428 = vadd.xlane.f32.xlu0 %v427_v57 }
 0x1b0   :  { %431 = vadd.xlane.f32.xlu0 %v430_v59 }
 0x1b4   :  { %434 = vadd.xlane.f32.xlu0 %v433_v61 }
 0x1d5   :  { %v1268_v62 = vpop.f32.mrf.mxu1 }
 0x1d7   :  { %v207_v63 = vpop.f32.mrf.mxu1 }
 0x1d9   :  { %v1269_v0 = vpop.f32.mrf.mxu1 }
 0x1db   :  { %v1639_v1 = vpop.f32.mrf.mxu1 }
 0x1dd   :  { %v1274_v2 = vpop.f32.mrf.mxu1 }
 0x1de   :  { %v1641_v3 = vadd.f32 %v1274_v2, %v1268_v62 }
 0x1df   :  { %v262_v4 = vpop.f32.mrf.mxu1 }
 0x1e0   :  { %v1643_v5 = vadd.f32 %v262_v4, %v207_v63 }
 0x1e1   :  { %v1275_v6 = vpop.f32.mrf.mxu1 }
 0x1e2   :  { %v1645_v9 = vadd.f32 %v1275_v6, %v1269_v0 }
 0x215   :  { %v630_v11 = vpop.xlane.xlu0 %629 }
 0x216   :  { %681 = vxpose.xlu1.b32.start [1/4] (short) (narrow) %v630_v11, 8 }
 0x217   :  { %v671_v12 = vpop.xlane.xlu1 %670 }
 0x219   :  { %v636_v14 = vpop.xlane.xlu0 %635 }
 0x21b   :  { %v633_v13 = vpop.xlane.xlu1 %632 }
 0x21c   :  { %682 = vxpose.xlu1.b32.cont [2/4] (short) (narrow) %v633_v13, 8 }
 0x21d   :  { %v639_v15 = vpop.xlane.xlu0 %638 }
 0x21f   :  { %v677_v16 = vpop.xlane.xlu1 %676 }
 0x220   :  { %683 = vxpose.xlu1.b32.cont [3/4] (short) (narrow) %v636_v14, 8 }
 0x221   :  { %v680_v19 = vpop.xlane.xlu0 %679 }
 0x223   :  { %v405_v20 = vpop.xlane.xlu1 %404 }
 0x224   :  { %684 = vxpose.xlu1.b32.end [4/4] (short) (narrow) %v639_v15, 8 }
 0x225   :  { %v408_v23 = vpop.xlane.xlu0 %407 }
 0x227   :  { %v411_v24 = vpop.xlane.xlu1 %410 }
 0x229   :  { %v674_v30 = vpop.xlane.xlu0 %673 }
 0x22d   :  { %v414_v55 = vpop.xlane.xlu0 %413 }
 0x231   :  { %v426_v57 = vpop.xlane.xlu0 %425 }
 0x235   :  { %v429_v58 = vpop.xlane.xlu0 %428 }
 0x239   :  { %v432_v59 = vpop.xlane.xlu0 %431 }
 0x23d   :  { %v435_v60 = vpop.xlane.xlu0 %434 }
 0x294   :  { %v697_v28 = vpop.trf.xlu1 }
 0x295   :  { %v716_v29 = vrot.slane %v697_v28, %v470_v25 }
 0x297   :  { %v717_v31 = vadd.f32 %v716_v29, %v671_v12  ;;  %v718_v32 = vadd.f32 %v716_v29, %v674_v30  ;;  %v719_v33 = vadd.f32 %v716_v29, %v677_v16  ;;  %v720_v41 = vadd.f32 %v716_v29, %v680_v19 }
 0x299   :  { %vm721_vm8 = vcmp.ge.f32.partialorder %v717_v31, 0.0  ;;  %v725_v36 = vmul.f32 0.2, %v717_v31  ;;  %vm722_vm9 = vcmp.ge.f32.partialorder %v718_v32, 0.0  ;;  %v726_v37 = vmul.f32 0.2, %v718_v32 }
 0x29a   :  { %v727_v8 = vmul.f32 0.2, %v719_v33  ;;  %vm723_vm13 = vcmp.ge.f32.partialorder %v719_v33, 0.0  ;;  %v728_v47 = vmul.f32 0.2, %v720_v41  ;;  %vm724_vm2 = vcmp.ge.f32.partialorder %v720_v41, 0.0 }
 0x29b   :  { %v729_v39 = vsel %vm721_vm8, %v717_v31, %v725_v36  ;;  %v730_v40 = vsel %vm722_vm9, %v718_v32, %v726_v37  ;;  %vm1424_vm9 = vmmov 0  }
 0x29c   :  { %v733_v42 = vsel %vm1657_vm7, %v729_v39, -1e+30  ;;  %v734_v44 = vsel %vm1662_vm10, %v730_v40, -1e+30  ;;  %v731_v46 = vsel %vm723_vm13, %v719_v33, %v727_v8  ;;  %v732_v50 = vsel %vm724_vm2, %v720_v41, %v728_v47 }
 0x29d   :  { %v737_v43 = vsel %vm103_vm1, %v733_v42, -inf  ;;  %v740_v53 = vsel %vm103_vm1, %v734_v44, -inf  ;;  %v735_v48 = vsel %vm1672_vm14, %v731_v46, -1e+30  ;;  %v736_v52 = vsel %vm1680_vm3, %v732_v50, -1e+30 }
 0x29e   :  { %738 = vmax.xlane.f32.xlu0 %v737_v43  ;;  %v743_v51 = vsel %vm103_vm1, %v735_v48, -inf  ;;  %v746_v54 = vsel %vm103_vm1, %v736_v52, -inf }
 0x2a2   :  { %741 = vmax.xlane.f32.xlu0 %v740_v53 }
 0x2a6   :  { %744 = vmax.xlane.f32.xlu0 %v743_v51 }
 0x2aa   :  { %747 = vmax.xlane.f32.xlu0 %v746_v54 }
 0x2d7   :  { %436 = vxpose.xlu0.b32.start [1/4] (short) (narrow) %v405_v20, 8 }
 0x2db   :  { %437 = vxpose.xlu0.b32.cont [2/4] (short) (narrow) %v408_v23, 8 }
 0x2df   :  { %438 = vxpose.xlu0.b32.cont [3/4] (short) (narrow) %v411_v24, 8 }
 0x2e3   :  { %439 = vxpose.xlu0.b32.end [4/4] (short) (narrow) %v414_v55, 8 }
 0x327   :  { %v739_v61 = vpop.xlane.xlu0 %738 }
 0x328   :  { %v749_v0 = vsub.f32 %v733_v42, %v739_v61 }
 0x32a   :  { %v753_v6 = vmul.f32 1.442695, %v749_v0 }
 0x32b   :  { %v742_v62 = vpop.xlane.xlu0 %741 }
 0x32c   :  { %v750_v2 = vsub.f32 %v734_v44, %v742_v62  ;;  %1365 = vpow2.f32 %v753_v6 }
 0x32e   :  { %v755_v11 = vmul.f32 1.442695, %v750_v2 }
 0x32f   :  { %v745_v63 = vpop.xlane.xlu0 %744 }
 0x330   :  { %v751_v14 = vsub.f32 %v735_v48, %v745_v63  ;;  %1367 = vpow2.f32 %v755_v11 }
 0x332   :  { %v757_v24 = vmul.f32 1.442695, %v751_v14 }
 0x333   :  { %v748_v4 = vpop.xlane.xlu0 %747 }
 0x334   :  { %v752_v26 = vsub.f32 %v736_v52, %v748_v4  ;;  %1369 = vpow2.f32 %v757_v24 }
 0x336   :  { %v759_v34 = vmul.f32 1.442695, %v752_v26 }
 0x338   :  { %1371 = vpow2.f32 %v759_v34 }
 0x339   :  { %v1366_v40 = vpop.eup %1365 }
 0x33a   :  { %v1704_v42 = vsel %vm1657_vm7, %v1366_v40, 0.0 }
 0x33b   :  { %v765_v43 = vsel %vm103_vm1, %v1704_v42, 0.0 }
 0x33d   :  { %v1368_v8 = vpop.eup %1367 }
 0x33e   :  { %v762_v44 = vsel %vm1662_vm10, %v1368_v8, 0.0 }
 0x33f   :  { %v768_v47 = vsel %vm103_vm1, %v762_v44, 0.0 }
 0x341   :  { %v1370_v46 = vpop.eup %1369 }
 0x342   :  { %v1713_v53 = vsel %vm1672_vm14, %v1370_v46, 0.0 }
 0x343   :  { %v771_v50 = vsel %vm103_vm1, %v1713_v53, 0.0 }
 0x345   :  { %v1372_v48 = vpop.eup %1371 }
 0x346   :  { %v764_v51 = vsel %vm1680_vm3, %v1372_v48, 0.0 }
 0x347   :  { %v774_v52 = vsel %vm103_vm1, %v764_v51, 0.0 }
 0x353   :  { %v452_v12 = vpop.trf.xlu0 }
 0x354   :  { %v471_v13 = vrot.slane %v452_v12, %v470_v25 }
 0x356   :  { %v473_v15 = vadd.f32 %v471_v13, %v429_v58  ;;  %v472_v16 = vadd.f32 %v471_v13, %v426_v57  ;;  %v474_v18 = vadd.f32 %v471_v13, %v432_v59  ;;  %v475_v19 = vadd.f32 %v471_v13, %v435_v60 }
 0x358   :  { %vm477_vm4 = vcmp.ge.f32.partialorder %v473_v15, 0.0  ;;  %v481_v20 = vmul.f32 0.2, %v473_v15  ;;  %vm476_vm5 = vcmp.ge.f32.partialorder %v472_v16, 0.0  ;;  %v480_v23 = vmul.f32 0.2, %v472_v16 }
 0x359   :  { %vm478_vm6 = vcmp.ge.f32.partialorder %v474_v18, 0.0  ;;  %v482_v27 = vmul.f32 0.2, %v474_v18  ;;  %v483_v30 = vmul.f32 0.2, %v475_v19  ;;  %vm479_vm8 = vcmp.ge.f32.partialorder %v475_v19, 0.0 }
 0x35a   :  { %v485_v28 = vsel %vm477_vm4, %v473_v15, %v481_v20  ;;  %v484_v29 = vsel %vm476_vm5, %v472_v16, %v480_v23 }
 0x35b   :  { %v489_v22 = vsel %vm1662_vm10, %v485_v28, -1e+30  ;;  %v488_v25 = vsel %vm1657_vm7, %v484_v29, -1e+30  ;;  %v486_v31 = vsel %vm478_vm6, %v474_v18, %v482_v27  ;;  %v487_v37 = vsel %vm479_vm8, %v475_v19, %v483_v30 }
 0x35c   :  { %v495_v32 = vsel %vm103_vm1, %v489_v22, -inf  ;;  %v492_v33 = vsel %vm103_vm1, %v488_v25, -inf  ;;  %v490_v36 = vsel %vm1672_vm14, %v486_v31, -1e+30  ;;  %v491_v39 = vsel %vm1680_vm3, %v487_v37, -1e+30 }
 0x35d   :  { %496 = vmax.xlane.f32.xlu0 %v495_v32  ;;  %493 = vmax.xlane.f32.xlu1 %v492_v33  ;;  %v498_v7 = vsel %vm103_vm1, %v490_v36, -inf  ;;  %v501_v41 = vsel %vm103_vm1, %v491_v39, -inf }
 0x361   :  { %499 = vmax.xlane.f32.xlu1 %v498_v7 }
 0x365   :  { %502 = vmax.xlane.f32.xlu1 %v501_v41 }
 0x369   :  { %766 = vadd.xlane.f32.xlu1 %v765_v43 }
 0x36d   :  { %769 = vadd.xlane.f32.xlu1 %v768_v47 }
 0x371   :  { %772 = vadd.xlane.f32.xlu1 %v771_v50 }
 0x373   :  { %789 = vrot.lane.b32.xlu0 %v1600_v21, %s1422_s3 }
 0x375   :  { %775 = vadd.xlane.f32.xlu1 %v774_v52 }
 0x386   :  { %791 = vrot.lane.b32.xlu1 %v1592_v17, %s1422_s3 }
 0x3e6   :  { %v497_v54 = vpop.xlane.xlu0 %496  ;;  %v494_v55 = vpop.xlane.xlu1 %493 }
 0x3e7   :  { %v505_v57 = vsub.f32 %v489_v22, %v497_v54  ;;  %v504_v58 = vsub.f32 %v488_v25, %v494_v55  ;;  %v265_v55 = vpop.f32.mrf.mxu1 }
 0x3e9   :  { %v510_v59 = vmul.f32 1.442695, %v505_v57  ;;  %v508_v60 = vmul.f32 1.442695, %v504_v58 }
 0x3ea   :  { %v500_v61 = vpop.xlane.xlu1 %499  ;;  %v790_v29 = vpop.permute.xlu0 %789 }
 0x3eb   :  { %1373 = vpow2.f32 %v510_v59  ;;  %v506_v62 = vsub.f32 %v490_v36, %v500_v61 }
 0x3ec   :  { %1375 = vpow2.f32 %v508_v60 }
 0x3ed   :  { %v512_v63 = vmul.f32 1.442695, %v506_v62 }
 0x3ee   :  { %v503_v0 = vpop.xlane.xlu1 %502 }
 0x3ef   :  { %1377 = vpow2.f32 %v512_v63  ;;  %v507_v21 = vsub.f32 %v491_v39, %v503_v0 }
 0x3f1   :  { %v514_v2 = vmul.f32 1.442695, %v507_v21 }
 0x3f2   :  { %v767_v4 = vpop.xlane.xlu1 %766 }
 0x3f3   :  { %1379 = vpow2.f32 %v514_v2 }
 0x3f4   :  { %1381 = vrcp.f32 %v767_v4 }
 0x3f6   :  { %v770_v6 = vpop.xlane.xlu1 %769 }
 0x3f7   :  { %1383 = vrcp.f32 %v770_v6 }
 0x3f8   :  { %v1374_v17 = vpop.eup %1373 }
 0x3f9   :  { %v1376_v11 = vpop.eup %1375  ;;  %v517_v12 = vsel %vm1662_vm10, %v1374_v17, 0.0  ;;  %vm1117_vm10 = vcmask 254976  }
 0x3fa   :  { %v773_v13 = vpop.xlane.xlu1 %772  ;;  %v523_v14 = vsel %vm103_vm1, %v517_v12, 0.0  ;;  %v516_v15 = vsel %vm1657_vm7, %v1376_v11, 0.0  ;;  %vm994_vm7 = vcmask 785408  }
 0x3fb   :  { %524 = vadd.xlane.f32.xlu0 %v523_v14  ;;  %v520_v16 = vsel %vm103_vm1, %v516_v15, 0.0  ;;  %1385 = vrcp.f32 %v773_v13 }
 0x3fc   :  { %v1378_v18 = vpop.eup %1377  ;;  %521 = vadd.xlane.f32.xlu1 %v520_v16 }
 0x3fd   :  { %v518_v19 = vsel %vm1672_vm14, %v1378_v18, 0.0 }
 0x3fe   :  { %v776_v20 = vpop.xlane.xlu1 %775  ;;  %v526_v23 = vsel %vm103_vm1, %v518_v19, 0.0 }
 0x3ff   :  { %1387 = vrcp.f32 %v776_v20  ;;  %v986_v20 = vld [vmem:[%s1867_s11 + $0x50] sm:$0xff] }
 0x400   :  { %v1380_v38 = vpop.eup %1379  ;;  %527 = vadd.xlane.f32.xlu1 %v526_v23  ;;  %v987_v23 = vld [vmem:[%s1867_s11 + $0x58] sm:$0xff] }
 0x401   :  { %v519_v24 = vsel %vm1680_vm3, %v1380_v38, 0.0  ;;  %v1382_v35 = vpop.eup %1381  ;;  %v984_v38 = vld [vmem:[%s1867_s11 + $0x40] sm:$0xff] }
 0x402   :  { %v792_v26 = vpop.permute.xlu1 %791  ;;  %v529_v27 = vsel %vm103_vm1, %v519_v24, 0.0  ;;  %v781_v45 = vmul.f32 %v1382_v35, %v1704_v42  ;;  %v985_v35 = vld [vmem:[%s1867_s11 + $0x48] sm:$0xff] }
 0x403   :  { %1292 = vmatprep.subr.bf16.mxu0 %v792_v26 }
 0x404   :  { %v1384_v28 = vpop.eup %1383  ;;  %530 = vadd.xlane.f32.xlu1 %v529_v27  ;;  %1293 = vmatpush3.bf16.msra.mxu0 %v792_v26  ;;  %v992_v26 = vpack.c.bf16 %v985_v35, %v984_v38  ;;  %v982_v27 = vld [vmem:[%s1867_s11 + $0x30] sm:$0xff] }
 0x405   :  { %1294 = vmatprep.subr.bf16.mxu0 %v790_v29  ;;  %v782_v30 = vmul.f32 %v1384_v28, %v762_v44  ;;  %v983_v28 = vld [vmem:[%s1867_s11 + $0x38] sm:$0xff] }
 0x407   :  { %v785_v22 = vpack.c.bf16 %v782_v30, %v781_v45  ;;  %v980_v45 = vld [vmem:[%s1867_s11 + $0x20] sm:$0xff]  ;;  %v981_v30 = vld [vmem:[%s1867_s11 + $0x28] sm:$0xff] }
 0x408   :  { %1295 = vmatpush3.bf16.msra.mxu0 %v790_v29  ;;  %v1386_v25 = vpop.eup %1385  ;;  %v991_v29 = vpack.c.bf16 %v983_v28, %v982_v27 }
 0x409   :  { %1296 = vmatprep.mubr.msk.bf16.mxu0 %vm103_vm1, %v785_v22  ;;  %v783_v31 = vmul.f32 %v1386_v25, %v1713_v53  ;;  %v990_v22 = vpack.c.bf16 %v981_v30, %v980_v45  ;;  %v1191_v25 = vld [vmem:[%s1861_s5] ss:$0 sm:$0xff] }
 0x40a   :  { %v1209_v45 = vld [vmem:[%s1868_s12] ss:$0 sm:$0xff] }
 0x40c   :  { %v1388_v49 = vpop.eup %1387 }
 0x40d   :  { %v784_v32 = vmul.f32 %v1388_v49, %v764_v51  ;;  %v266_v49 = vadd.f32 %v265_v55, %v1639_v1  ;;  %v962_v55 = vld [vmem:[%s1866_s10 + $0x30] sm:$0xff] }
 0x40f   :  { %v786_v33 = vpack.c.bf16 %v784_v32, %v783_v31  ;;  %v286_v31 = vadd.f32 %v1191_v25, %v1641_v3  ;;  %v287_v32 = vadd.f32 %v1191_v25, %v1645_v9 }
 0x411   :  { %1297 = vmatmul.mubr.msk.bf16.vlgmr.msra.gmra.mxu0 %vm103_vm1, %v786_v33  ;;  %v284_v33 = vadd.f32 %v1191_v25, %v1643_v5 }
 0x484   :  { %v525_v34 = vpop.xlane.xlu0 %524 }
 0x485   :  { %1389 = vrcp.f32 %v525_v34  ;;  %v522_v36 = vpop.xlane.xlu1 %521  ;;  %v285_v34 = vadd.f32 %v1191_v25, %v266_v49 }
 0x486   :  { %1391 = vrcp.f32 %v522_v36 }
 0x489   :  { %v528_v37 = vpop.xlane.xlu1 %527 }
 0x48a   :  { %1393 = vrcp.f32 %v528_v37  ;;  %v290_v37 = vmax.f32 %v286_v31, 0.0 }
 0x48d   :  { %v531_v7 = vpop.xlane.xlu1 %530 }
 0x48e   :  { %1395 = vrcp.f32 %v531_v7  ;;  %v291_v7 = vmax.f32 %v287_v32, 0.0 }
 0x492   :  { %v1390_v39 = vpop.eup %1389 }
 0x493   :  { %v1392_v40 = vpop.eup %1391  ;;  %v537_v8 = vmul.f32 %v1390_v39, %v517_v12 }
 0x494   :  { %v536_v41 = vmul.f32 %v1392_v40, %v516_v15 }
 0x496   :  { %v540_v42 = vpack.c.bf16 %v537_v8, %v536_v41  ;;  %v288_v8 = vmax.f32 %v284_v33, 0.0  ;;  %v289_v41 = vmax.f32 %v285_v34, 0.0 }
 0x497   :  { %v1394_v43 = vpop.eup %1393 }
 0x498   :  { %1288 = vmatprep.mubr.msk.bf16.mxu1 %vm103_vm1, %v540_v42  ;;  %v538_v46 = vmul.f32 %v1394_v43, %v518_v19 }
 0x49b   :  { %v1396_v44 = vpop.eup %1395 }
 0x49c   :  { %v539_v47 = vmul.f32 %v1396_v44, %v519_v24  ;;  %v993_v24 = vpack.c.bf16 %v987_v23, %v986_v20  ;;  %v1423_v20 = vmov 0.0   ;;  %v1116_v23 = vld [vmem:[%s1858_s2] sm:$0x3]  ;;  %s1425_s2 = smov [#allocation2]  }
 0x49d   :  { %v1118_v38 = vsel %vm1117_vm10, %v1116_v23, 0.0  ;;  %s1177_s12 = sshll.u32 %s1425_s2, 4  ;;  %s1178_s12 = int_to_ptr.vmem [resolvable:$true] %s1177_s12 }
 0x49e   :  { %v541_v53 = vpack.c.bf16 %v539_v47, %v538_v46  ;;  %1308 = vmatprep.subr.bf16.mxu0 %v993_v24  ;;  %v966_v47 = vld [vmem:[%s1866_s10 + $0x50] sm:$0xff]  ;;  %p1404_p1 = scmp.lt.s32.totalorder %s1178_s12, %s1178_s12 }
 0x49f   :  { %1309 = vmatpush3.bf16.msra.mxu0 %v993_v24 }
 0x4a0   :  { %1289 = vmatmul.mubr.msk.bf16.vlgmr.msra.gmra.mxu1 %vm103_vm1, %v541_v53  ;;  %1310 = vmatprep.subr.bf16.mxu0 %v992_v26  ;;  %v967_v53 = vld [vmem:[%s1866_s10 + $0x58] sm:$0xff] }
 0x4a1   :  { %1304 = vmatprep.mubr.msk.bf16.mxu1 %vm103_vm1, %v1523_v10  ;;  %v1202_v10 = vld [vmem:[%s1865_s9] ss:$0 sm:$0xff]  ;;  %s1399_s9 = scalar_lea.vmem %s1178_s12, 32 }
 0x4a2   :  { %p1400_p0 = scmp.ne.s32.totalorder %s1178_s12, %s1399_s9  ;;  %p1405_p2 = scmp.lt.s32.totalorder %s1399_s9, %s1399_s9 }
 0x4a3   :  { %1311 = vmatpush3.bf16.msra.mxu0 %v992_v26 }
 0x4a4   :  { %1312 = vmatprep.subr.bf16.mxu0 %v991_v29  ;;  %p1406_p3 = por %p1405_p2, %p1404_p1 }
 0x4a6   :  { %p1407_p4 = pnand %p1406_p3, %p1400_p0 }
 0x4a7   :  { %1313 = vmatpush3.bf16.msra.mxu0 %v991_v29 }
 0x4a8   :  { %1314 = vmatprep.subr.bf16.mxu0 %v990_v22 }
 0x4ab   :  { %1315 = vmatpush3.bf16.msra.mxu0 %v990_v22 }
 0x4d1   :  { %v1298_v48 = vpop.f32.mrf.mxu0 }
 0x4d2   :  { %858 = vrot.lane.b32.xlu1 %v1298_v48, %s1421_s21 }
 0x4d3   :  { %v835_v50 = vpop.f32.mrf.mxu0 }
 0x4d5   :  { %v1299_v51 = vpop.f32.mrf.mxu0 }
 0x4d6   :  { %854 = vrot.lane.b32.xlu1 %v835_v50, %s1421_s21  ;;  %860 = vrot.lane.b32.xlu0 %v1299_v51, %s1421_s21  ;;  %v973_v50 = vpack.c.bf16 %v967_v53, %v966_v47  ;;  %v964_v51 = vld [vmem:[%s1866_s10 + $0x40] sm:$0xff] }
 0x4d7   :  { %v838_v52 = vpop.f32.mrf.mxu0 }
 0x4da   :  { %856 = vrot.lane.b32.xlu1 %v838_v52, %s1421_s21  ;;  %v965_v52 = vld [vmem:[%s1866_s10 + $0x48] sm:$0xff] }
 0x544   :  { %v859_v54 = vpop.permute.xlu1 %858 }
 0x548   :  { %v855_v57 = vpop.permute.xlu1 %854  ;;  %v861_v62 = vpop.permute.xlu0 %860 }
 0x54c   :  { %v857_v2 = vpop.permute.xlu1 %856 }
 0x560   :  { %v1290_v58 = vpop.f32.mrf.mxu1 }
 0x561   :  { %v868_v59 = vsel %vm103_vm1, %v1290_v58, %v859_v54  ;;  %v972_v54 = vpack.c.bf16 %v965_v52, %v964_v51 }
 0x562   :  { %v584_v60 = vpop.f32.mrf.mxu1  ;;  %v879_v63 = vadd.f32 %v1202_v10, %v868_v59  ;;  %v960_v59 = vld [vmem:[%s1866_s10 + $0x20] sm:$0xff] }
 0x563   :  { %v866_v61 = vsel %vm103_vm1, %v584_v60, %v855_v57  ;;  %v963_v57 = vld [vmem:[%s1866_s10 + $0x38] sm:$0xff] }
 0x564   :  { %v1291_v0 = vpop.f32.mrf.mxu1  ;;  %v877_v4 = vadd.f32 %v1202_v10, %v866_v61  ;;  %v883_v12 = vmax.f32 %v879_v63, 0.0  ;;  %v971_v58 = vpack.c.bf16 %v963_v57, %v962_v55  ;;  %v959_v61 = vld [vmem:[%s1866_s10 + $0x18] sm:$0xff]  ;;  %v956_v63 = vld [vmem:[%s1866_s10] sm:$0xff] }
 0x565   :  { %v869_v21 = vsel %vm103_vm1, %v1291_v0, %v861_v62  ;;  %v957_v0 = vld [vmem:[%s1866_s10 + $0x8] sm:$0xff] }
 0x566   :  { %v880_v6 = vadd.f32 %v1202_v10, %v869_v21  ;;  %v587_v17 = vpop.f32.mrf.mxu1  ;;  %v881_v15 = vmax.f32 %v877_v4, 0.0  ;;  %v968_v21 = vpack.c.bf16 %v957_v0, %v956_v63  ;;  %v979_v4 = vld [vmem:[%s1867_s11 + $0x18] sm:$0xff] }
 0x567   :  { %v867_v11 = vsel %vm103_vm1, %v587_v17, %v857_v2  ;;  %v978_v2 = vld [vmem:[%s1867_s11 + $0x10] sm:$0xff]  ;;  %v976_v17 = vld [vmem:[%s1867_s11] sm:$0xff] }
 0x568   :  { %v884_v13 = vmax.f32 %v880_v6, 0.0  ;;  %v878_v14 = vadd.f32 %v1202_v10, %v867_v11  ;;  %v961_v10 = vld [vmem:[%s1866_s10 + $0x28] sm:$0xff]  ;;  %v989_v6 = vpack.c.bf16 %v979_v4, %v978_v2 }
 0x569   :  { %v970_v60 = vpack.c.bf16 %v961_v10, %v960_v59  ;;  %v977_v11 = vld [vmem:[%s1867_s11 + $0x8] sm:$0xff] }
 0x56a   :  { %v882_v16 = vmax.f32 %v878_v14, 0.0  ;;  %v1353_v18 = vpack.i.bf16 %v884_v13, %v883_v12  ;;  %1316 = vmatprep.subr.bf16.mxu0 %v989_v6  ;;  %v988_v12 = vpack.c.bf16 %v977_v11, %v976_v17 }
 0x56b   :  { %1317 = vmatpush3.bf16.msra.mxu0 %v989_v6 }
 0x56c   :  { %1354 = vrot.lane.b32.xlu0 %v1353_v18, %s1421_s21  ;;  %v1358_v19 = vpack.i.bf16 %v882_v16, %v881_v15  ;;  %1318 = vmatprep.subr.bf16.mxu0 %v988_v12 }
 0x56e   :  { %1359 = vrot.lane.b32.xlu1 %v1358_v19, %s1421_s21 }
 0x56f   :  { %1319 = vmatpush3.bf16.msra.mxu0 %v988_v12 }
 0x570   :  { %1340 = vmatprep.subr.bf16.mxu0 %v1423_v20 }
 0x58b   :  { %1119 = vadd.xlane.f32.xlu0 %v1118_v38 }
 0x5de   :  { %v1355_v36 = vpop.permute.xlu0 %1354 }
 0x5df   :  { %v1357_v39 = vunpack.i.h.bf16 %v1355_v36  ;;  %v1356_v40 = vunpack.i.l.bf16 %v1355_v36 }
 0x5e0   :  { %v1360_v42 = vpop.permute.xlu1 %1359 }
 0x5e1   :  { %v1362_v43 = vunpack.i.h.bf16 %v1360_v42  ;;  %v1361_v44 = vunpack.i.l.bf16 %v1360_v42  ;;  %v903_v46 = vsel %vm103_vm1, %v290_v37, %v1356_v40  ;;  %v904_v1 = vsel %vm103_vm1, %v291_v7, %v1357_v39 }
 0x5e2   :  { %v906_v3 = vpack.c.bf16 %v904_v1, %v903_v46  ;;  %v1121_v40 = vpack.c.bf16 %v1116_v23, %v1116_v23 }
 0x5e3   :  { %v901_v9 = vsel %vm103_vm1, %v288_v8, %v1361_v44  ;;  %v902_v5 = vsel %vm103_vm1, %v289_v41, %v1362_v43 }
 0x5e4   :  { %1300 = vmatprep.subr.bf16.mxu1 %v906_v3  ;;  %v905_v48 = vpack.c.bf16 %v902_v5, %v901_v9 }
 0x5e5   :  { %1301 = vmatpush3.bf16.msra.mxu1 %v906_v3 }
 0x5e6   :  { %1302 = vmatprep.subr.bf16.mxu1 %v905_v48 }
 0x5e9   :  { %1303 = vmatpush3.bf16.msra.mxu1 %v905_v48 }
 0x5ea   :  { %1324 = vmatprep.subr.bf16.mxu1 %v973_v50 }
 0x5ec   :  { %1305 = vmatmul.mubr.msk.bf16.vlgmr.msra.gmra.mxu1 %vm103_vm1, %v1555_v56  ;;  %v958_v56 = vld [vmem:[%s1866_s10 + $0x10] sm:$0xff] }
 0x5ed   :  { %1325 = vmatpush3.bf16.msra.mxu1 %v973_v50  ;;  %1336 = vmatprep.mubr.msk.bf16.mxu1 %vm994_vm7, %v905_v48  ;;  %v969_v62 = vpack.c.bf16 %v959_v61, %v958_v56 }
 0x5ee   :  { %1326 = vmatprep.subr.bf16.mxu1 %v972_v54 }
 0x5f1   :  { %1327 = vmatpush3.bf16.msra.mxu1 %v972_v54 }
 0x5f2   :  { %1328 = vmatprep.subr.bf16.mxu1 %v971_v58 }
 0x5f5   :  { %1329 = vmatpush3.bf16.msra.mxu1 %v971_v58 }
 0x5f6   :  { %1330 = vmatprep.subr.bf16.mxu1 %v970_v60 }
 0x5f9   :  { %1331 = vmatpush3.bf16.msra.mxu1 %v970_v60 }
 0x5fa   :  { %1332 = vmatprep.subr.bf16.mxu1 %v969_v62 }
 0x5fd   :  { %1333 = vmatpush3.bf16.msra.mxu1 %v969_v62 }
 0x5fe   :  { %1334 = vmatprep.subr.bf16.mxu1 %v968_v21 }
 0x601   :  { %1335 = vmatpush3.bf16.msra.mxu1 %v968_v21 }
 0x604   :  { %1337 = vmatmul.mubr.msk.bf16.vlgmr.msra.gmra.mxu1 %vm994_vm7, %v906_v3 }
 0x614   :  { %v1120_v8 = vpop.xlane.xlu0 %1119 }
 0x615   :  { %1397 = vrcp.f32 %v1120_v8 }
 0x622   :  { %v1398_v41 = vpop.eup %1397 }
 0x6ac   :  { %v1306_v13 = vpop.f32.mrf.mxu1 }
 0x6ae   :  { %v941_v14 = vpop.f32.mrf.mxu1 }
 0x6b0   :  { %v1307_v15 = vpop.f32.mrf.mxu1 }
 0x6b1   :  { %v975_v19 = vpack.c.bf16 %v1307_v15, %v1306_v13 }
 0x6b2   :  { %v944_v16 = vpop.f32.mrf.mxu1 }
 0x6b3   :  { %v974_v18 = vpack.c.bf16 %v944_v16, %v941_v14 }
 0x6b5   :  { %1320 = vmatprep.mubr.msk.bf16.mxu0 %vm994_vm7, %v974_v18 }
 0x6b6   :  { %1321 = vmatmul.mubr.msk.bf16.vlgmr.msra.gmra.mxu0 %vm994_vm7, %v975_v19 }
 0x6b7   :  { %1344 = vmatprep.mubr.msk.bf16.mxu0 %vm1424_vm9, %v1423_v20 }
 0x6c4   :  { %v1338_v24 = vpop.f32.mrf.mxu1 }
 0x6c6   :  { %v1090_v35 = vpop.f32.mrf.mxu1 }
 0x6c8   :  { %v1339_v27 = vpop.f32.mrf.mxu1 }
 0x6ca   :  { %v1093_v25 = vpop.f32.mrf.mxu1 }
 0x776   :  { %v1322_v26 = vpop.f32.mrf.mxu0 }
 0x777   :  { %v1099_v29 = vadd.f32 %v1338_v24, %v1322_v26 }
 0x778   :  { %v1035_v28 = vpop.f32.mrf.mxu0 }
 0x779   :  { %v1114_v31 = vadd.f32 %v1209_v45, %v1099_v29  ;;  %v1091_v32 = vadd.f32 %v1090_v35, %v1035_v28 }
 0x77a   :  { %v1323_v30 = vpop.f32.mrf.mxu0 }
 0x77b   :  { %v1102_v22 = vadd.f32 %v1339_v27, %v1323_v30  ;;  %v1112_v7 = vadd.f32 %v1209_v45, %v1091_v32 }
 0x77c   :  { %v1038_v49 = vpop.f32.mrf.mxu0 }
 0x77d   :  { %v1115_v33 = vadd.f32 %v1209_v45, %v1102_v22  ;;  %v1094_v34 = vadd.f32 %v1093_v25, %v1038_v49 }
 0x77f   :  { %v1123_v36 = vpack.c.bf16 %v1115_v33, %v1114_v31  ;;  %v1113_v37 = vadd.f32 %v1209_v45, %v1094_v34 }
 0x781   :  { %1341 = vmatpush3.bf16.msra.mxu0 %v1123_v36  ;;  %v1122_v39 = vpack.c.bf16 %v1113_v37, %v1112_v7 }
 0x782   :  { %1342 = vmatprep.subr.bf16.mxu0 %v1423_v20 }
 0x785   :  { %1343 = vmatpush3.bf16.msra.mxu0 %v1122_v39 }
 0x788   :  { %1345 = vmatmul.mubr.msk.bf16.vlgmr.msra.gmra.mxu0 %vm103_vm1, %v1121_v40 }
 0x848   :  { %v1161_v42 = vpop.f32.mrf.mxu0 }
 0x849   :  { %v1168_v43 = vmul.f32 %v1398_v41, %v1161_v42 }
 0x84a   :  { %v1346_v44 = vpop.f32.mrf.mxu0 }
 0x84b   :  { %1170 = vst.msk [vmem:[#allocation2] sm:$0x3] %vm1169_vm11, %v1168_v43 }
 0x84c   :  { %v1164_v46 = vpop.f32.mrf.mxu0 }
 0x84d   :  { %1410 = shalt.err (!%p1407_p4)
}
 0x84e   :  { %1180 = dma.vmem_to_hbm [thread:$0]  %s1178_s12, 32, %s1869_s13, [#allocation3]   ;;  %v1347_v1 = vpop.f32.mrf.mxu0 }
 0x84f   :  { %1419 = dma.done.wait [#allocation3], 32  }
 0x850   :  { %1420 = vsyncadd [#allocation3], 4294967264 }
 0x851   :  { %1184 = vsyncpa [#allocation3], 1 }

</bundles_post_ra>
